<compile_context>
chip_gen: v5e
topology: v5e:2x2
jax: 0.10.0
libtpu: 0.0.40
codegen_flags: <defaults>
</compile_context>

<pallas_src>
import functools

import numpy as np
import jax
import jax.numpy as jnp
from jax.experimental import pallas as pl
from jax.experimental.pallas import tpu as pltpu


def _round_up(x: int, m: int) -> int:
    return ((x + m - 1) // m) * m


def _dft_chunk_matrices(T: int, Tp: int, Fk: int, Kc: int):
    """bf16 forward / inverse real-DFT matrices, zero-padded and laid out in
    frequency chunks: chunk c occupies columns/rows [c*2*Fk, (c+1)*2*Fk) with
    the cosine (real) half first and the sine (imag) half second.  Padded
    rows/columns are zero, so they contribute nothing."""
    F = T // 2 + 1
    Fpad = Kc * Fk
    t = np.arange(T, dtype=np.float64)
    k = np.arange(F, dtype=np.float64)
    ang = 2.0 * np.pi * np.outer(t, k) / T
    Ct = np.cos(ang)          # (T, F):  Xr = x @ Ct
    St = -np.sin(ang)         # (T, F):  Xi = x @ St

    # irfft weights: DC (and Nyquist for even T) counted once, others twice.
    w = np.full((F,), 2.0)
    w[0] = 1.0
    if T % 2 == 0:
        w[-1] = 1.0
    ang2 = 2.0 * np.pi * np.outer(k, t) / T
    ICos = (w[:, None] / T) * np.cos(ang2)     # (F, T): out += Xr @ ICos
    ISin = -(w[:, None] / T) * np.sin(ang2)    # (F, T): out += Xi @ ISin

    CtP = np.zeros((Tp, Fpad), np.float32);   CtP[:T, :F] = Ct
    StP = np.zeros((Tp, Fpad), np.float32);   StP[:T, :F] = St
    ICosP = np.zeros((Fpad, Tp), np.float32); ICosP[:F, :T] = ICos
    ISinP = np.zeros((Fpad, Tp), np.float32); ISinP[:F, :T] = ISin

    fwd = np.zeros((Tp, Kc * 2 * Fk), np.float32)
    inv = np.zeros((Kc * 2 * Fk, Tp), np.float32)
    for c in range(Kc):
        lo, hi = c * Fk, (c + 1) * Fk
        base = 2 * c * Fk
        fwd[:, base:base + Fk] = CtP[:, lo:hi]
        fwd[:, base + Fk:base + 2 * Fk] = StP[:, lo:hi]
        inv[base:base + Fk, :] = ICosP[lo:hi, :]
        inv[base + Fk:base + 2 * Fk, :] = ISinP[lo:hi, :]
    return jnp.asarray(fwd, jnp.bfloat16), jnp.asarray(inv, jnp.bfloat16)


def _freq_mask_kernel(x_ref, fwd_ref, inv_ref, m_ref, o_ref, acc_ref, *, fk):
    c = pl.program_id(1)

    @pl.when(c == 0)
    def _():
        acc_ref[...] = jnp.zeros_like(acc_ref)

    # forward DFT chunk on the MXU: (TN, Tp) @ (Tp, 2*Fk) -> (TN, 2*Fk)
    # (bf16 operands, f32 accumulation); columns are [real half | imag half].
    y = jnp.dot(x_ref[...], fwd_ref[...], preferred_element_type=jnp.float32)

    # Apply the per-bin mask to the two lane-aligned halves (no concat temp).
    m = m_ref[...]                               # (TN, Fk) f32, values {0, 1}
    yr = (y[:, :fk] * m).astype(jnp.bfloat16)
    yi = (y[:, fk:] * m).astype(jnp.bfloat16)

    # Inverse DFT chunk, accumulated across frequency chunks in f32.
    part = jnp.dot(yr, inv_ref[:fk, :], preferred_element_type=jnp.float32)
    part = part + jnp.dot(yi, inv_ref[fk:, :], preferred_element_type=jnp.float32)
    acc_ref[...] += part

    @pl.when(c == pl.num_programs(1) - 1)
    def _():
        o_ref[...] = acc_ref[...].astype(o_ref.dtype)


def _maybe_buffered_spec(shape, index_map, buffer_count):
    """BlockSpec with pipeline_mode=pl.Buffered(n) when requested/supported."""
    if buffer_count is None or not hasattr(pl, "Buffered"):
        return pl.BlockSpec(shape, index_map)
    try:
        return pl.BlockSpec(shape, index_map, pipeline_mode=pl.Buffered(buffer_count))
    except TypeError:  # older BlockSpec signature without pipeline_mode
        return pl.BlockSpec(shape, index_map)


def freq_mask_pallas(x, key, ratio: float):
    """x: (B, C, T) float.  Returns (masked x, mask) with mask: (B, C, T//2+1)."""
    B, C, T = x.shape
    F = T // 2 + 1
    N = B * C

    Tp = _round_up(T, 128)                 # lane-dense time axis
    Fp = _round_up(F, 128)                 # lane-dense frequency axis

    # Frequency-chunk size: cap each streamed bf16 DFT slab at ~4 MiB so the
    # resident working set stays bounded (fits v7x's 64 MiB VMEM) for any T.
    slab_budget = 4 << 20
    fk_cap = max(128, (slab_budget // (Tp * 2 * 2)) // 128 * 128)
    Fk = min(Fp, fk_cap)
    Kc = -(-Fp // Fk)                      # number of frequency chunks
    Fpad = Kc * Fk

    # Row tile: multiple of 8 sublanes, <=256; force >=2 grid steps when
    # possible so both v7x TensorCores share the 'parallel' axis.
    TN = min(256, _round_up(N, 8))
    Np = _round_up(N, TN)
    if Np // TN < 2 and TN > 8:
        TN = _round_up((TN + 1) // 2, 8)
        Np = _round_up(N, TN)
    # TODO(synk): on v5e/v6e (128 MiB VMEM, single TC) allow TN up to 512 for
    # very large N to amortize per-grid-step overhead.

    fwd, inv = _dft_chunk_matrices(T, Tp, Fk, Kc)

    # bf16 input path: MXU operands are bf16 anyway, halves the x DMA stream.
    # Explicit zero-padding (never rely on OOB reads) keeps the pad inert.
    x2 = jnp.pad(x.reshape(N, T).astype(jnp.bfloat16),
                 ((0, Np - N), (0, Tp - T)))

    # Host-side random mask, same semantics as torch.rand(x_fft.shape) > ratio.
    # TODO(synk): switch to the in-kernel hardware PRNG (pltpu.prng_seed /
    # prng_random_bits) on real TPUs to avoid this input stream; it has no
    # interpret/CPU lowering, so the portable host path is used here.
    mask = (jax.random.uniform(key, (N, F), dtype=jnp.float32)
            > jnp.float32(ratio)).astype(jnp.float32)
    m2 = jnp.pad(mask, ((0, Np - N), (0, Fpad - F)))

    # Single-buffer the DFT slabs when they never change across the grid.
    mat_bufs = 1 if Kc == 1 else None      # None -> default double buffering

    # VMEM budget derived from the actual buffers (+50% headroom, capped).
    nbuf_mat = 1 if Kc == 1 else 2
    vmem_need = (2 * TN * Tp * 2                    # x tiles (bf16, 2 bufs)
                 + nbuf_mat * (Tp * 2 * Fk) * 2     # fwd slab(s), bf16
                 + nbuf_mat * (2 * Fk * Tp) * 2     # inv slab(s), bf16
                 + 2 * TN * Fk * 4                  # mask tiles
                 + 2 * TN * Tp * 4                  # out tiles (f32/x.dtype)
                 + TN * Tp * 4                      # f32 accumulator
                 + 4 * TN * 2 * Fk * 4)             # in-kernel temporaries
    vmem_limit = int(min(max(vmem_need * 3 // 2, 16 << 20), 96 << 20))

    out = pl.pallas_call(
        functools.partial(_freq_mask_kernel, fk=Fk),
        out_shape=jax.ShapeDtypeStruct((Np, Tp), x.dtype),
        grid=(Np // TN, Kc),
        in_specs=[
            pl.BlockSpec((TN, Tp), lambda i, c: (i, 0)),              # x rows
            _maybe_buffered_spec((Tp, 2 * Fk), lambda i, c: (0, c),
                                 mat_bufs),                           # fwd slab
            _maybe_buffered_spec((2 * Fk, Tp), lambda i, c: (c, 0),
                                 mat_bufs),                           # inv slab
            pl.BlockSpec((TN, Fk), lambda i, c: (i, c)),              # mask tile
        ],
        out_specs=pl.BlockSpec((TN, Tp), lambda i, c: (i, 0)),        # masked x
        scratch_shapes=[pltpu.VMEM((TN, Tp), jnp.float32)],           # accumulator
        compiler_params=pltpu.CompilerParams(
            dimension_semantics=("parallel", "arbitrary"),
            vmem_limit_bytes=vmem_limit),
    )(x2, fwd, inv, m2)

    out = out[:N, :T].reshape(B, C, T)
    return out, mask.reshape(B, C, F)


def frequency_mask(x, key, ratio: float = 0.0, training: bool = True):
    """Module-level forward: identity in eval mode, masked DFT roundtrip in train."""
    if not training:
        return x
    out, _ = freq_mask_pallas(x, key, ratio)
    return out


def _reference(x, mask, T):
    x_fft = jnp.fft.rfft(x.astype(jnp.float32), axis=-1)
    return jnp.fft.irfft(x_fft * mask, n=T, axis=-1)


if __name__ == "__main__":
    B, C, T = 2, 4, 16
    ratio = 0.3

    root = jax.random.PRNGKey(0)
    data_key, mask_key = jax.random.split(root)
    x = jax.random.normal(data_key, (B, C, T), dtype=jnp.float32)

    out, mask = freq_mask_pallas(x, mask_key, ratio)
    out = jax.block_until_ready(out)

    ref = _reference(x, mask, T)
    err = float(jnp.max(jnp.abs(out - ref)))
    # bf16 MXU operands -> relaxed tolerance vs the f32 FFT reference.
    assert err < 1.5e-1, f"max abs error too large: {err}"

    # sanity: the mask actually keeps something
    keep_frac = float(jnp.mean(mask))
    assert 0.0 < keep_frac <= 1.0, f"degenerate mask keep fraction: {keep_frac}"

    # eval mode is identity
    out_eval = frequency_mask(x, mask_key, ratio=ratio, training=False)
    assert bool(jnp.all(out_eval == x))

    print("KERNEL_OK")
</pallas_src>

<mosaic_0001>
module attributes {stable_mosaic.version = 11 : i64} {
  func.func @_freq_mask_kernel(%arg0: i32, %arg1: i32, %arg2: memref<8x128xbf16, #tpu.memory_space<vmem>>, %arg3: memref<128x256xbf16, #tpu.memory_space<vmem>>, %arg4: memref<256x128xbf16, #tpu.memory_space<vmem>>, %arg5: memref<8x128xf32, #tpu.memory_space<vmem>>, %arg6: memref<8x128xf32, #tpu.memory_space<vmem>>, %arg7: memref<8x128xf32, #tpu.memory_space<vmem>>) attributes {dimension_semantics = [#tpu.dimension_semantics<parallel>, #tpu.dimension_semantics<arbitrary>], iteration_bounds = array<i64: 1, 1>, scalar_prefetch = 0 : i64, scratch_operands = 1 : i64, tpu.core_type = #tpu.core_type<tc>, window_params = [{transform_indices = @transform_0, window_bounds = array<i64: 8, 128>}, {pipeline_mode = #tpu.pipeline_mode<synchronous>, transform_indices = @transform_1, window_bounds = array<i64: 128, 256>}, {pipeline_mode = #tpu.pipeline_mode<synchronous>, transform_indices = @transform_2, window_bounds = array<i64: 256, 128>}, {transform_indices = @transform_3, window_bounds = array<i64: 8, 128>}, {transform_indices = @transform_4, window_bounds = array<i64: 8, 128>}]} {
    %c0_i32 = arith.constant 0 : i32
    %0 = arith.cmpi eq, %arg1, %c0_i32 : i32
    %1 = arith.extui %0 : i1 to i32
    %c0_i32_0 = arith.constant 0 : i32
    %2 = arith.cmpi ne, %1, %c0_i32_0 : i32
    scf.if %2 {
      %cst_17 = arith.constant 0.000000e+00 : f32
      %24 = vector.broadcast %cst_17 : f32 to vector<8x128xf32>
      %c0_18 = arith.constant 0 : index
      %c0_19 = arith.constant 0 : index
      %25 = vector.load %arg7[%c0_18, %c0_19] : memref<8x128xf32, #tpu.memory_space<vmem>>, vector<8x128xf32>
      tpu.vector_store %arg7[%c0_18, %c0_19], %24 {strides = array<i32>} : memref<8x128xf32, #tpu.memory_space<vmem>>, vector<8x128xf32>,
    } else {
    }
    %c0 = arith.constant 0 : index
    %c0_1 = arith.constant 0 : index
    %3 = vector.load %arg2[%c0, %c0_1] : memref<8x128xbf16, #tpu.memory_space<vmem>>, vector<8x128xbf16>
    %c0_2 = arith.constant 0 : index
    %c0_3 = arith.constant 0 : index
    %4 = vector.load %arg3[%c0_2, %c0_3] : memref<128x256xbf16, #tpu.memory_space<vmem>>, vector<128x256xbf16>
    %cst = arith.constant dense<0.000000e+00> : vector<8x256xf32>
    %5 = tpu.matmul %3, %4, %cst {dimension_numbers = #tpu.dot_dimension_numbers<[1], [0], [0], [1], [0, 0, 1, 1], [], []>} : vector<8x128xbf16>, vector<128x256xbf16>, vector<8x256xf32> -> vector<8x256xf32>
    %c0_4 = arith.constant 0 : index
    %c0_5 = arith.constant 0 : index
    %6 = vector.load %arg5[%c0_4, %c0_5] : memref<8x128xf32, #tpu.memory_space<vmem>>, vector<8x128xf32>
    %7 = vector.extract_strided_slice %5 {offsets = [0, 0], sizes = [8, 128], strides = [1, 1]} : vector<8x256xf32> to vector<8x128xf32>
    %8 = arith.mulf %7, %6 : vector<8x128xf32>
    %9 = arith.truncf %8 : vector<8x128xf32> to vector<8x128xbf16>
    %10 = vector.extract_strided_slice %5 {offsets = [0, 128], sizes = [8, 128], strides = [1, 1]} : vector<8x256xf32> to vector<8x128xf32>
    %11 = arith.mulf %10, %6 : vector<8x128xf32>
    %12 = arith.truncf %11 : vector<8x128xf32> to vector<8x128xbf16>
    %c0_6 = arith.constant 0 : index
    %c0_7 = arith.constant 0 : index
    %13 = vector.load %arg4[%c0_6, %c0_7] : memref<256x128xbf16, #tpu.memory_space<vmem>>, vector<128x128xbf16>
    %cst_8 = arith.constant dense<0.000000e+00> : vector<8x128xf32>
    %14 = tpu.matmul %9, %13, %cst_8 {dimension_numbers = #tpu.dot_dimension_numbers<[1], [0], [0], [1], [0, 0, 1, 1], [], []>} : vector<8x128xbf16>, vector<128x128xbf16>, vector<8x128xf32> -> vector<8x128xf32>
    %c128 = arith.constant 128 : index
    %c0_9 = arith.constant 0 : index
    %15 = vector.load %arg4[%c128, %c0_9] : memref<256x128xbf16, #tpu.memory_space<vmem>>, vector<128x128xbf16>
    %cst_10 = arith.constant dense<0.000000e+00> : vector<8x128xf32>
    %16 = tpu.matmul %12, %15, %cst_10 {dimension_numbers = #tpu.dot_dimension_numbers<[1], [0], [0], [1], [0, 0, 1, 1], [], []>} : vector<8x128xbf16>, vector<128x128xbf16>, vector<8x128xf32> -> vector<8x128xf32>
    %17 = arith.addf %14, %16 : vector<8x128xf32>
    %c0_11 = arith.constant 0 : index
    %c0_12 = arith.constant 0 : index
    %18 = vector.load %arg7[%c0_11, %c0_12] : memref<8x128xf32, #tpu.memory_space<vmem>>, vector<8x128xf32>
    %19 = arith.addf %18, %17 : vector<8x128xf32>
    %c0_13 = arith.constant 0 : index
    %c0_14 = arith.constant 0 : index
    %20 = vector.load %arg7[%c0_13, %c0_14] : memref<8x128xf32, #tpu.memory_space<vmem>>, vector<8x128xf32>
    tpu.vector_store %arg7[%c0_13, %c0_14], %19 {strides = array<i32>} : memref<8x128xf32, #tpu.memory_space<vmem>>, vector<8x128xf32>,
    %c0_i32_15 = arith.constant 0 : i32
    %21 = arith.cmpi eq, %arg1, %c0_i32_15 : i32
    %22 = arith.extui %21 : i1 to i32
    %c0_i32_16 = arith.constant 0 : i32
    %23 = arith.cmpi ne, %22, %c0_i32_16 : i32
    scf.if %23 {
      %c0_17 = arith.constant 0 : index
      %c0_18 = arith.constant 0 : index
      %24 = vector.load %arg7[%c0_17, %c0_18] : memref<8x128xf32, #tpu.memory_space<vmem>>, vector<8x128xf32>
      %c0_19 = arith.constant 0 : index
      %c0_20 = arith.constant 0 : index
      %25 = vector.load %arg6[%c0_19, %c0_20] : memref<8x128xf32, #tpu.memory_space<vmem>>, vector<8x128xf32>
      tpu.vector_store %arg6[%c0_19, %c0_20], %24 {strides = array<i32>} : memref<8x128xf32, #tpu.memory_space<vmem>>, vector<8x128xf32>,
    } else {
    }
    return
  }
  func.func @transform_0(%arg0: i32, %arg1: i32) -> (i32, i32) {
    %c0_i32 = arith.constant 0 : i32
    %c0_i32_0 = arith.constant 0 : i32
    return %arg0, %c0_i32 : i32, i32
  }
  func.func @transform_1(%arg0: i32, %arg1: i32) -> (i32, i32) {
    %c0_i32 = arith.constant 0 : i32
    %c0_i32_0 = arith.constant 0 : i32
    return %c0_i32, %arg1 : i32, i32
  }
  func.func @transform_2(%arg0: i32, %arg1: i32) -> (i32, i32) {
    %c0_i32 = arith.constant 0 : i32
    %c0_i32_0 = arith.constant 0 : i32
    return %arg1, %c0_i32 : i32, i32
  }
  func.func @transform_3(%arg0: i32, %arg1: i32) -> (i32, i32) {
    %c0_i32 = arith.constant 0 : i32
    return %arg0, %arg1 : i32, i32
  }
  func.func @transform_4(%arg0: i32, %arg1: i32) -> (i32, i32) {
    %c0_i32 = arith.constant 0 : i32
    %c0_i32_0 = arith.constant 0 : i32
    return %arg0, %c0_i32 : i32, i32
  }
}

</mosaic_0001>

<bundles_post_ra>
// kernel: tpu_custom_call.1
= control target key start
LH: loop header
LB: loop body
LE: loop exit
PB: predicated region body
PF: predicated region fallthrough
CT: control target
= control target key end

     0   :  { %9 = vsyncpa [#allocation4], 0  ;;  %s737_s0 = inlined_call_operand.hbm [shape: bf16[8,128], index: 0, kind: input, shape index: {}]   ;;  %s738_s1 = inlined_call_operand.hbm [shape: bf16[128,256], index: 1, kind: input, shape index: {}]   ;;  %s739_s2 = inlined_call_operand.hbm [shape: bf16[256,128], index: 2, kind: input, shape index: {}]   ;;  %s740_s3 = inlined_call_operand.hbm [shape: f32[8,128], index: 3, kind: input, shape index: {}]   ;;  %s741_s4 = inlined_call_operand.hbm [shape: f32[8,128], index: 4, kind: output, shape index: {}]  }
   0x1   :  { %10 = vsyncpa [#allocation7], 0 }
   0x2   :  { %11 = vsyncpa [#allocation10], 0  ;;  %s28_s17 = sshll.u32 %s738_s1, 4  ;;  %s29_s17 = int_to_ptr.hbm [resolvable:$true] %s28_s17 }
   0x3   :  { %12 = vsyncpa [#allocation5], 0  ;;  %s688_s18 = smov [#allocation6]   ;;  %s18_s22 = sshll.u32 %s737_s0, 4  ;;  %s19_s22 = int_to_ptr.hbm [resolvable:$true] %s18_s22 }
   0x4   :  { %s30_s19 = sshll.u32 %s688_s18, 4  ;;  %s689_s23 = smov 128   ;;  %s31_s19 = int_to_ptr.vmem [resolvable:$true] %s30_s19 }
   0x5   :  { %s690_s24 = smov 8   ;;  %s691_s25 = smov [#allocation3]  }
   0x6   :  { %36 = dma.hbm_to_vmem [thread:$0]  %s29_s17, 2048, %s31_s19, [#allocation7], %s689_s23, %s689_s23, %s690_s24  }
   0x7   :  { %s20_s26 = sshll.u32 %s691_s25, 4  ;;  %s41_s29 = sshll.u32 %s739_s2, 4  ;;  %s21_s26 = int_to_ptr.vmem [resolvable:$true] %s20_s26  ;;  %s42_s29 = int_to_ptr.hbm [resolvable:$true] %s41_s29 }
   0x8   :  { %23 = dma.hbm_to_vmem [thread:$0]  %s19_s22, 64, %s21_s26, [#allocation4]  }
   0x9   :  { %s692_s1 = smov [#allocation8]   ;;  %s55_s0 = sshll.u32 %s740_s3, 4  ;;  %s56_s0 = int_to_ptr.hbm [resolvable:$true] %s55_s0 }
   0xa   :  { %s43_s30 = sshll.u32 %s692_s1, 4  ;;  %s693_s7 = smov 64   ;;  %s44_s30 = int_to_ptr.vmem [resolvable:$true] %s43_s30 }
   0xb   :  { %s694_s8 = smov 4   ;;  %s695_s9 = smov [#allocation9]  }
   0xc   :  { %49 = dma.hbm_to_vmem [thread:$0]  %s42_s29, 2048, %s44_s30, [#allocation7], %s693_s7, %s693_s7, %s694_s8  }
   0xd   :  { %s57_s10 = sshll.u32 %s695_s9, 4  ;;  %s58_s10 = int_to_ptr.vmem [resolvable:$true] %s57_s10 }
   0xe   :  { %60 = dma.hbm_to_vmem [thread:$0]  %s56_s0, 128, %s58_s10, [#allocation10]  }
   0xf   :  { %680 = dma.done.wait [#allocation4], 64  }
  0x10   :  { %681 = vsyncadd [#allocation4], 4294967232 }
  0x11   :  { %682 = dma.done.wait [#allocation7], 4096  }
  0x12   :  { %683 = vsyncadd [#allocation7], 4294963200 }
  0x13   :  { %684 = dma.done.wait [#allocation10], 128  }
  0x14   :  { %685 = vsyncadd [#allocation10], 4294967168  ;;  %v449_v0 = vld [vmem:[#allocation6 + $0x70] sm:$0xf]  ;;  %v534_v1 = vld [vmem:[#allocation6 + $0x74] sm:$0xf0] }
  0x15   :  { %v533_v2 = vld [vmem:[#allocation6 + $0x74] sm:$0xf]  ;;  %v450_v3 = vor.u32 %v534_v1, %v449_v0  ;;  %v451_v4 = vld [vmem:[#allocation6 + $0x78] sm:$0xf0]  ;;  %v441_v5 = vld [vmem:[#allocation6 + $0x60] sm:$0xf] }
  0x16   :  { %v532_v6 = vld [vmem:[#allocation6 + $0x64] sm:$0xf0]  ;;  %v454_v7 = vor.u32 %v533_v2, %v451_v4  ;;  %v531_v8 = vld [vmem:[#allocation6 + $0x64] sm:$0xf]  ;;  %v443_v9 = vld [vmem:[#allocation6 + $0x68] sm:$0xf0] }
  0x17   :  { %179 = vmatpush.bf16.msra.mxu0 %v450_v3  ;;  %v442_v10 = vor.u32 %v532_v6, %v441_v5  ;;  %v446_v11 = vor.u32 %v531_v8, %v443_v9  ;;  %v433_v12 = vld [vmem:[#allocation6 + $0x50] sm:$0xf]  ;;  %v530_v13 = vld [vmem:[#allocation6 + $0x54] sm:$0xf0]  ;;  %v529_v14 = vld [vmem:[#allocation6 + $0x54] sm:$0xf] }
  0x18   :  { %192 = vmatpush.bf16.msra.mxu1 %v454_v7  ;;  %v435_v15 = vld [vmem:[#allocation6 + $0x58] sm:$0xf0]  ;;  %v434_v16 = vor.u32 %v530_v13, %v433_v12  ;;  %v425_v18 = vld [vmem:[#allocation6 + $0x40] sm:$0xf]  ;;  %v528_v19 = vld [vmem:[#allocation6 + $0x44] sm:$0xf0] }
  0x19   :  { %v438_v17 = vor.u32 %v529_v14, %v435_v15  ;;  %v527_v20 = vld [vmem:[#allocation6 + $0x44] sm:$0xf]  ;;  %v427_v21 = vld [vmem:[#allocation6 + $0x48] sm:$0xf0]  ;;  %v426_v22 = vor.u32 %v528_v19, %v425_v18  ;;  %v550_v23 = vld [vmem:[#allocation8 + $0x78] sm:$0xff]  ;;  %s696_s2 = smov [#allocation11]  }
  0x1a   :  { %v542_v24 = vld [vmem:[#allocation8 + $0x38] sm:$0xff]  ;;  %v430_v25 = vor.u32 %v527_v20, %v427_v21  ;;  %v417_v26 = vld [vmem:[#allocation6 + $0x30] sm:$0xf]  ;;  %v525_v28 = vld [vmem:[#allocation6 + $0x34] sm:$0xf]  ;;  %290 = vmatpush.bf16.msra.mxu2 %v550_v23  ;;  %s377_s3 = sshll.u32 %s696_s2, 4  ;;  %s378_s3 = int_to_ptr.vmem [resolvable:$true] %s377_s3 }
  0x1b   :  { %180 = vmatpush.bf16.msra.mxu0 %v442_v10  ;;  %v526_v27 = vld [vmem:[#allocation6 + $0x34] sm:$0xf0]  ;;  %v419_v29 = vld [vmem:[#allocation6 + $0x38] sm:$0xf0]  ;;  %351 = vmatpush.bf16.msra.mxu3 %v542_v24  ;;  %v549_v30 = vld [vmem:[#allocation8 + $0x70] sm:$0xff]  ;;  %s379_s13 = sshll.u32 %s741_s4, 4  ;;  %s380_s13 = int_to_ptr.hbm [resolvable:$true] %s379_s13 }
  0x1c   :  { %193 = vmatpush.bf16.msra.mxu1 %v446_v11  ;;  %v541_v31 = vld [vmem:[#allocation8 + $0x30] sm:$0xff]  ;;  %v418_v32 = vor.u32 %v526_v27, %v417_v26  ;;  %v422_v33 = vor.u32 %v525_v28, %v419_v29  ;;  %v409_v34 = vld [vmem:[#allocation6 + $0x20] sm:$0xf]  ;;  %v524_v35 = vld [vmem:[#allocation6 + $0x24] sm:$0xf0] }
  0x1d   :  { %v523_v36 = vld [vmem:[#allocation6 + $0x24] sm:$0xf]  ;;  %v411_v37 = vld [vmem:[#allocation6 + $0x28] sm:$0xf0]  ;;  %v410_v40 = vor.u32 %v524_v35, %v409_v34  ;;  %v401_v42 = vld [vmem:[#allocation6 + $0x10] sm:$0xf] }
  0x1e   :  { %291 = vmatpush.bf16.msra.mxu2 %v549_v30  ;;  %v548_v38 = vld [vmem:[#allocation8 + $0x68] sm:$0xff]  ;;  %v414_v41 = vor.u32 %v523_v36, %v411_v37  ;;  %v522_v43 = vld [vmem:[#allocation6 + $0x14] sm:$0xf0]  ;;  %v521_v44 = vld [vmem:[#allocation6 + $0x14] sm:$0xf] }
  0x1f   :  { %181 = vmatpush.bf16.msra.mxu0 %v434_v16  ;;  %352 = vmatpush.bf16.msra.mxu3 %v541_v31  ;;  %v540_v39 = vld [vmem:[#allocation8 + $0x28] sm:$0xff]  ;;  %v403_v45 = vld [vmem:[#allocation6 + $0x18] sm:$0xf0]  ;;  %v547_v46 = vld [vmem:[#allocation8 + $0x60] sm:$0xff]  ;;  %v402_v48 = vor.u32 %v522_v43, %v401_v42 }
  0x20   :  { %194 = vmatpush.bf16.msra.mxu1 %v438_v17  ;;  %v539_v47 = vld [vmem:[#allocation8 + $0x20] sm:$0xff]  ;;  %v406_v49 = vor.u32 %v521_v44, %v403_v45  ;;  %v520_v51 = vld [vmem:[#allocation6 + $0x4] sm:$0xf0]  ;;  %v395_v53 = vld [vmem:[#allocation6 + $0x8] sm:$0xf0] }
  0x21   :  { %v393_v50 = vld [vmem:[#allocation6] sm:$0xf]  ;;  %v519_v52 = vld [vmem:[#allocation6 + $0x4] sm:$0xf]  ;;  %v546_v54 = vld [vmem:[#allocation8 + $0x58] sm:$0xff] }
  0x22   :  { %292 = vmatpush.bf16.msra.mxu2 %v548_v38  ;;  %v538_v55 = vld [vmem:[#allocation8 + $0x18] sm:$0xff]  ;;  %v394_v56 = vor.u32 %v520_v51, %v393_v50  ;;  %v398_v57 = vor.u32 %v519_v52, %v395_v53  ;;  %v545_v58 = vld [vmem:[#allocation8 + $0x50] sm:$0xff]  ;;  %v544_v61 = vld [vmem:[#allocation8 + $0x48] sm:$0xff] }
  0x23   :  { %182 = vmatpush.bf16.msra.mxu0 %v426_v22  ;;  %353 = vmatpush.bf16.msra.mxu3 %v540_v39  ;;  %v537_v59 = vld [vmem:[#allocation8 + $0x10] sm:$0xff]  ;;  %v82_v60 = vld [vmem:[#allocation3] sm:$0xf]  ;;  %v536_v62 = vld [vmem:[#allocation8 + $0x8] sm:$0xff] }
  0x24   :  { %195 = vmatpush.bf16.msra.mxu1 %v430_v25  ;;  %v543_v63 = vld [vmem:[#allocation8 + $0x40] sm:$0xff] }
  0x25   :  { %v535_v0 = vld [vmem:[#allocation8] sm:$0xff] }
  0x26   :  { %293 = vmatpush.bf16.msra.mxu2 %v547_v46  ;;  %v205_v1 = vld [vmem:[#allocation9] sm:$0xff] }
  0x27   :  { %183 = vmatpush.bf16.msra.mxu0 %v418_v32  ;;  %354 = vmatpush.bf16.msra.mxu3 %v539_v47 }
  0x28   :  { %196 = vmatpush.bf16.msra.mxu1 %v422_v33 }
  0x2a   :  { %294 = vmatpush.bf16.msra.mxu2 %v546_v54 }
  0x2b   :  { %184 = vmatpush.bf16.msra.mxu0 %v410_v40  ;;  %355 = vmatpush.bf16.msra.mxu3 %v538_v55 }
  0x2c   :  { %197 = vmatpush.bf16.msra.mxu1 %v414_v41 }
  0x2e   :  { %295 = vmatpush.bf16.msra.mxu2 %v545_v58 }
  0x2f   :  { %185 = vmatpush.bf16.msra.mxu0 %v402_v48  ;;  %356 = vmatpush.bf16.msra.mxu3 %v537_v59 }
  0x30   :  { %198 = vmatpush.bf16.msra.mxu1 %v406_v49 }
  0x32   :  { %296 = vmatpush.bf16.msra.mxu2 %v544_v61 }
  0x33   :  { %186 = vmatpush.bf16.msra.mxu0 %v394_v56  ;;  %357 = vmatpush.bf16.msra.mxu3 %v536_v62 }
  0x34   :  { %199 = vmatpush.bf16.msra.mxu1 %v398_v57 }
  0x36   :  { %187 = vmatmul.bf16.vlgmr.msra.gmra.mxu0 %v82_v60  ;;  %297 = vmatpush.bf16.msra.mxu2 %v543_v63 }
  0x37   :  { %200 = vmatmul.bf16.vlgmr.msra.gmra.mxu1 %v82_v60  ;;  %358 = vmatpush.bf16.msra.mxu3 %v535_v0 }
  0xb3   :  { %v188_v2 = vpop.f32.mrf.mxu0 }
  0xb4   :  { %v206_v3 = vmul.f32 %v205_v1, %v188_v2  ;;  %v201_v4 = vpop.f32.mrf.mxu1 }
  0xb5   :  { %v208_v5 = vmul.f32 %v205_v1, %v201_v4 }
  0xb6   :  { %v207_v6 = vpack.c.bf16 %v206_v3, %v206_v3 }
  0xb7   :  { %v209_v7 = vpack.c.bf16 %v208_v5, %v208_v5 }
  0xb8   :  { %359 = vmatmul.bf16.vlgmr.msra.gmra.mxu3 %v207_v6 }
  0xb9   :  { %298 = vmatmul.bf16.vlgmr.msra.gmra.mxu2 %v209_v7 }
  0xbb   :  { %v190_v8 = vpop.f32.mrf.mxu0 }
  0xbc   :  { %v203_v9 = vpop.f32.mrf.mxu1 }
 0x13b   :  { %v360_v10 = vpop.f32.mrf.mxu3 }
 0x13c   :  { %v299_v11 = vpop.f32.mrf.mxu2 }
 0x13d   :  { %v361_v12 = vadd.f32 %v360_v10, %v299_v11 }
 0x13f   :  { %371 = vst [vmem:[#allocation11] sm:$0xff] %v361_v12 }
 0x140   :  { %382 = dma.vmem_to_hbm [thread:$0]  %s378_s3, 128, %s380_s13, [#allocation5]  }
 0x143   :  { %v362_v13 = vpop.f32.mrf.mxu3 }
 0x144   :  { %v301_v14 = vpop.f32.mrf.mxu2 }
 0x145   :  { %686 = dma.done.wait [#allocation5], 128  }
 0x146   :  { %687 = vsyncadd [#allocation5], 4294967168 }
 0x147   :  { %387 = vsyncpa [#allocation4], 1 }
 0x148   :  { %388 = vsyncpa [#allocation7], 1 }
 0x149   :  { %389 = vsyncpa [#allocation10], 1 }
 0x14a   :  { %390 = vsyncpa [#allocation5], 1 }

</bundles_post_ra>
